<compile_context>
chip_gen: v6e
topology: v6e:2x2x1
jax: 0.10.0
libtpu: 0.0.40
codegen_flags: <defaults>
</compile_context>

<pallas_src>
import functools

import jax
import jax.numpy as jnp
from jax.experimental import pallas as pl
from jax.experimental.pallas import tpu as pltpu


def _proj_logsoftmax_kernel(x_ref, w_ref, b_ref, o_ref, m_sc, l_sc):
    # x_ref: (tm, d_model) bf16   w_ref: (d_model, tn) bf16   b_ref: (1, tn) f32
    # o_ref: (tm, vocab_p) f32 — resident across the vocab grid axis
    # m_sc / l_sc: (tm, 1) f32 running max / running sum(exp)
    j = pl.program_id(1)
    nj = pl.num_programs(1)
    tn = w_ref.shape[1]

    @pl.when(j == 0)
    def _():
        m_sc[...] = jnp.full_like(m_sc, -jnp.inf)
        l_sc[...] = jnp.zeros_like(l_sc)

    # MXU matmul: bf16 operands, f32 accumulation; bias added in f32.
    logits = jnp.dot(x_ref[...], w_ref[...], preferred_element_type=jnp.float32)
    logits = logits + b_ref[...]

    # Stash raw logits into the resident output buffer (finalized at the last step).
    col = pl.multiple_of(j * tn, 128)
    o_ref[:, pl.ds(col, tn)] = logits

    # Online LSE update (all f32; exp goes to the EUP — free filler next to the MXU).
    m_prev = m_sc[...]
    m_new = jnp.maximum(m_prev, jnp.max(logits, axis=-1, keepdims=True))
    l_sc[...] = l_sc[...] * jnp.exp(m_prev - m_new) + jnp.sum(
        jnp.exp(logits - m_new), axis=-1, keepdims=True
    )
    m_sc[...] = m_new

    @pl.when(j == nj - 1)
    def _():
        lse = m_sc[...] + jnp.log(l_sc[...])
        o_ref[...] = o_ref[...] - lse


def _round_up(x, m):
    return ((x + m - 1) // m) * m


@functools.partial(jax.jit, static_argnames=("tm", "tn", "vmem_limit_bytes"))
def projection_layer(x, w, b, *, tm=256, tn=512, vmem_limit_bytes=64 * 1024 * 1024):
    """
    x: (batch, seq_len, d_model) float32
    w: (d_model, vocab_size)     float32   (transposed PyTorch nn.Linear weight)
    b: (vocab_size,)             float32
    returns: (batch, seq_len, vocab_size) float32 log-probabilities
    """
    batch, seq_len, d_model = x.shape
    vocab = w.shape[1]
    rows = batch * seq_len

    # Effective tiles: clamp to the (padded) problem size, keep (8,128) alignment.
    tm_eff = min(tm, _round_up(rows, 8))
    tn_eff = min(tn, _round_up(vocab, 128))

    rows_p = _round_up(rows, tm_eff)
    vocab_p = _round_up(vocab, tn_eff)

    # bf16 matmul operands; f32 accumulation happens inside the kernel.
    x2 = x.reshape(rows, d_model).astype(jnp.bfloat16)
    if rows_p != rows:
        x2 = jnp.pad(x2, ((0, rows_p - rows), (0, 0)))
    wb = w.astype(jnp.bfloat16)
    b2 = b.reshape(1, vocab).astype(jnp.float32)
    if vocab_p != vocab:
        wb = jnp.pad(wb, ((0, 0), (0, vocab_p - vocab)))
        # Large negative bias on padded columns: they never win the running max and
        # contribute exp(~-1e9) == 0 to the softmax denominator.
        b2 = jnp.pad(b2, ((0, 0), (0, vocab_p - vocab)), constant_values=-1e9)

    grid = (rows_p // tm_eff, vocab_p // tn_eff)  # rows parallel, vocab reduction last

    # TODO(synk): for very large vocab on v7x (64 MiB VMEM), shrink tm / tn (the resident
    # (tm, vocab_p) f32 output block is the dominant VMEM consumer) or add a k-tile on d_model.
    out = pl.pallas_call(
        _proj_logsoftmax_kernel,
        out_shape=jax.ShapeDtypeStruct((rows_p, vocab_p), jnp.float32),
        grid_spec=pltpu.PrefetchScalarGridSpec(
            num_scalar_prefetch=0,
            grid=grid,
            in_specs=[
                pl.BlockSpec((tm_eff, d_model), lambda i, j: (i, 0)),
                pl.BlockSpec((d_model, tn_eff), lambda i, j: (0, j)),
                pl.BlockSpec((1, tn_eff), lambda i, j: (0, j)),
            ],
            # Output block stays resident (constant index over j) across the vocab
            # reduction so the log-softmax can be finalized in place; HBM writeback
            # is a full, lane-dense vocab_p-wide slab per row tile.
            out_specs=pl.BlockSpec((tm_eff, vocab_p), lambda i, j: (i, 0)),
            scratch_shapes=[
                pltpu.VMEM((tm_eff, 1), jnp.float32),  # running max
                pltpu.VMEM((tm_eff, 1), jnp.float32),  # running sum(exp)
            ],
        ),
        compiler_params=pltpu.CompilerParams(
            dimension_semantics=("parallel", "arbitrary"),
            vmem_limit_bytes=vmem_limit_bytes,
        ),
    )(x2, wb, b2)

    return out[:rows, :vocab].reshape(batch, seq_len, vocab)


if __name__ == "__main__":
    # Small shapes consistent with the module's forward:
    # (batch, seq_len, d_model) -> (batch, seq_len, vocab_size)
    batch, seq_len, d_model, vocab_size = 2, 8, 32, 128

    key = jax.random.PRNGKey(0)
    kx, kw, kb = jax.random.split(key, 3)

    # Deterministic init mimicking nn.Linear's uniform(-1/sqrt(d_model), 1/sqrt(d_model))
    bound = 1.0 / (d_model ** 0.5)
    w = jax.random.uniform(kw, (d_model, vocab_size), jnp.float32, -bound, bound)
    b = jax.random.uniform(kb, (vocab_size,), jnp.float32, -bound, bound)
    x = jax.random.normal(kx, (batch, seq_len, d_model), jnp.float32)

    out = projection_layer(x, w, b)
    jax.block_until_ready(out)

    # Reference at matching precision (bf16 matmul operands, f32 accumulation).
    logits_ref = jnp.dot(
        x.reshape(-1, d_model).astype(jnp.bfloat16),
        w.astype(jnp.bfloat16),
        preferred_element_type=jnp.float32,
    ).astype(jnp.float32) + b
    ref = jax.nn.log_softmax(logits_ref, axis=-1).reshape(batch, seq_len, vocab_size)

    assert out.shape == (batch, seq_len, vocab_size)
    assert out.dtype == jnp.float32
    assert jnp.allclose(out, ref, atol=2e-3, rtol=2e-3)

    # Loose sanity check against full-f32 math (accounts for bf16 matmul rounding).
    ref_f32 = jax.nn.log_softmax(jnp.einsum("bsd,dv->bsv", x, w) + b, axis=-1)
    assert jnp.allclose(out, ref_f32, atol=5e-2, rtol=5e-2)

    print("KERNEL_OK")
</pallas_src>

<mosaic_0001>
module attributes {stable_mosaic.version = 11 : i64} {
  func.func @_proj_logsoftmax_kernel(%arg0: i32, %arg1: i32, %arg2: memref<16x32xbf16, #tpu.memory_space<vmem>>, %arg3: memref<32x128xbf16, #tpu.memory_space<vmem>>, %arg4: memref<1x128xf32, #tpu.memory_space<vmem>>, %arg5: memref<16x128xf32, #tpu.memory_space<vmem>>, %arg6: memref<16x1xf32, #tpu.memory_space<vmem>>, %arg7: memref<16x1xf32, #tpu.memory_space<vmem>>) attributes {dimension_semantics = [#tpu.dimension_semantics<parallel>, #tpu.dimension_semantics<arbitrary>], iteration_bounds = array<i64: 1, 1>, scalar_prefetch = 0 : i64, scratch_operands = 2 : i64, tpu.core_type = #tpu.core_type<tc>, window_params = [{transform_indices = @transform_0, window_bounds = array<i64: 16, 32>}, {transform_indices = @transform_1, window_bounds = array<i64: 32, 128>}, {transform_indices = @transform_2, window_bounds = array<i64: 1, 128>}, {transform_indices = @transform_3, window_bounds = array<i64: 16, 128>}]} {
    %c0_i32 = arith.constant 0 : i32
    %0 = arith.cmpi eq, %arg1, %c0_i32 : i32
    %1 = arith.extui %0 : i1 to i32
    %c0_i32_0 = arith.constant 0 : i32
    %2 = arith.cmpi ne, %1, %c0_i32_0 : i32
    scf.if %2 {
      %cst_19 = arith.constant 0xFF800000 : f32
      %32 = vector.broadcast %cst_19 : f32 to vector<16x1xf32>
      %c0_20 = arith.constant 0 : index
      %c0_21 = arith.constant 0 : index
      %33 = vector.load %arg6[%c0_20, %c0_21] : memref<16x1xf32, #tpu.memory_space<vmem>>, vector<16x1xf32>
      tpu.vector_store %arg6[%c0_20, %c0_21], %32 {strides = array<i32>} : memref<16x1xf32, #tpu.memory_space<vmem>>, vector<16x1xf32>,
      %cst_22 = arith.constant 0.000000e+00 : f32
      %34 = vector.broadcast %cst_22 : f32 to vector<16x1xf32>
      %c0_23 = arith.constant 0 : index
      %c0_24 = arith.constant 0 : index
      %35 = vector.load %arg7[%c0_23, %c0_24] : memref<16x1xf32, #tpu.memory_space<vmem>>, vector<16x1xf32>
      tpu.vector_store %arg7[%c0_23, %c0_24], %34 {strides = array<i32>} : memref<16x1xf32, #tpu.memory_space<vmem>>, vector<16x1xf32>,
    } else {
    }
    %c0 = arith.constant 0 : index
    %c0_1 = arith.constant 0 : index
    %3 = vector.load %arg2[%c0, %c0_1] : memref<16x32xbf16, #tpu.memory_space<vmem>>, vector<16x32xbf16>
    %c0_2 = arith.constant 0 : index
    %c0_3 = arith.constant 0 : index
    %4 = vector.load %arg3[%c0_2, %c0_3] : memref<32x128xbf16, #tpu.memory_space<vmem>>, vector<32x128xbf16>
    %cst = arith.constant dense<0.000000e+00> : vector<16x128xf32>
    %5 = tpu.matmul %3, %4, %cst {dimension_numbers = #tpu.dot_dimension_numbers<[1], [0], [0], [1], [0, 0, 1, 1], [], []>} : vector<16x32xbf16>, vector<32x128xbf16>, vector<16x128xf32> -> vector<16x128xf32>
    %c0_4 = arith.constant 0 : index
    %c0_5 = arith.constant 0 : index
    %6 = vector.load %arg4[%c0_4, %c0_5] : memref<1x128xf32, #tpu.memory_space<vmem>>, vector<1x128xf32>
    %7 = vector.broadcast %6 : vector<1x128xf32> to vector<16x128xf32>
    %8 = arith.addf %5, %7 : vector<16x128xf32>
    %c128_i32 = arith.constant 128 : i32
    %9 = arith.muli %arg1, %c128_i32 : i32
    %10 = tpu.assume_multiple %9, 128 : i32
    %c0_6 = arith.constant 0 : index
    %11 = arith.index_cast %10 : i32 to index
    %12 = vector.load %arg5[%c0_6, %11] : memref<16x128xf32, #tpu.memory_space<vmem>>, vector<16x128xf32>
    tpu.vector_store %arg5[%c0_6, %11], %8 {strides = array<i32>} : memref<16x128xf32, #tpu.memory_space<vmem>>, vector<16x128xf32>,
    %c0_7 = arith.constant 0 : index
    %c0_8 = arith.constant 0 : index
    %13 = vector.load %arg6[%c0_7, %c0_8] : memref<16x1xf32, #tpu.memory_space<vmem>>, vector<16x1xf32>
    %cst_9 = arith.constant dense<0xFF800000> : vector<16xf32>
    %14 = vector.multi_reduction <maximumf>, %8, %cst_9 [1] : vector<16x128xf32> to vector<16xf32>
    %15 = vector.shape_cast %14 : vector<16xf32> to vector<16x1xf32>
    %16 = arith.maximumf %13, %15 : vector<16x1xf32>
    %c0_10 = arith.constant 0 : index
    %c0_11 = arith.constant 0 : index
    %17 = vector.load %arg7[%c0_10, %c0_11] : memref<16x1xf32, #tpu.memory_space<vmem>>, vector<16x1xf32>
    %18 = arith.subf %13, %16 : vector<16x1xf32>
    %19 = math.exp %18 : vector<16x1xf32>
    %20 = arith.mulf %17, %19 : vector<16x1xf32>
    %21 = vector.broadcast %16 : vector<16x1xf32> to vector<16x128xf32>
    %22 = arith.subf %8, %21 : vector<16x128xf32>
    %23 = math.exp %22 : vector<16x128xf32>
    %cst_12 = arith.constant dense<0.000000e+00> : vector<16xf32>
    %24 = vector.multi_reduction <add>, %23, %cst_12 [1] : vector<16x128xf32> to vector<16xf32>
    %25 = vector.shape_cast %24 : vector<16xf32> to vector<16x1xf32>
    %26 = arith.addf %20, %25 : vector<16x1xf32>
    %c0_13 = arith.constant 0 : index
    %c0_14 = arith.constant 0 : index
    %27 = vector.load %arg7[%c0_13, %c0_14] : memref<16x1xf32, #tpu.memory_space<vmem>>, vector<16x1xf32>
    tpu.vector_store %arg7[%c0_13, %c0_14], %26 {strides = array<i32>} : memref<16x1xf32, #tpu.memory_space<vmem>>, vector<16x1xf32>,
    %c0_15 = arith.constant 0 : index
    %c0_16 = arith.constant 0 : index
    %28 = vector.load %arg6[%c0_15, %c0_16] : memref<16x1xf32, #tpu.memory_space<vmem>>, vector<16x1xf32>
    tpu.vector_store %arg6[%c0_15, %c0_16], %16 {strides = array<i32>} : memref<16x1xf32, #tpu.memory_space<vmem>>, vector<16x1xf32>,
    %c0_i32_17 = arith.constant 0 : i32
    %29 = arith.cmpi eq, %arg1, %c0_i32_17 : i32
    %30 = arith.extui %29 : i1 to i32
    %c0_i32_18 = arith.constant 0 : i32
    %31 = arith.cmpi ne, %30, %c0_i32_18 : i32
    scf.if %31 {
      %c0_19 = arith.constant 0 : index
      %c0_20 = arith.constant 0 : index
      %32 = vector.load %arg6[%c0_19, %c0_20] : memref<16x1xf32, #tpu.memory_space<vmem>>, vector<16x1xf32>
      %c0_21 = arith.constant 0 : index
      %c0_22 = arith.constant 0 : index
      %33 = vector.load %arg7[%c0_21, %c0_22] : memref<16x1xf32, #tpu.memory_space<vmem>>, vector<16x1xf32>
      %34 = math.log %33 : vector<16x1xf32>
      %35 = arith.addf %32, %34 : vector<16x1xf32>
      %c0_23 = arith.constant 0 : index
      %c0_24 = arith.constant 0 : index
      %36 = vector.load %arg5[%c0_23, %c0_24] : memref<16x128xf32, #tpu.memory_space<vmem>>, vector<16x128xf32>
      %37 = vector.broadcast %35 : vector<16x1xf32> to vector<16x128xf32>
      %38 = arith.subf %36, %37 : vector<16x128xf32>
      %c0_25 = arith.constant 0 : index
      %c0_26 = arith.constant 0 : index
      %39 = vector.load %arg5[%c0_25, %c0_26] : memref<16x128xf32, #tpu.memory_space<vmem>>, vector<16x128xf32>
      tpu.vector_store %arg5[%c0_25, %c0_26], %38 {strides = array<i32>} : memref<16x128xf32, #tpu.memory_space<vmem>>, vector<16x128xf32>,
    } else {
    }
    return
  }
  func.func @transform_0(%arg0: i32, %arg1: i32) -> (i32, i32) {
    %c0_i32 = arith.constant 0 : i32
    %c0_i32_0 = arith.constant 0 : i32
    return %arg0, %c0_i32 : i32, i32
  }
  func.func @transform_1(%arg0: i32, %arg1: i32) -> (i32, i32) {
    %c0_i32 = arith.constant 0 : i32
    %c0_i32_0 = arith.constant 0 : i32
    return %c0_i32, %arg1 : i32, i32
  }
  func.func @transform_2(%arg0: i32, %arg1: i32) -> (i32, i32) {
    %c0_i32 = arith.constant 0 : i32
    %c0_i32_0 = arith.constant 0 : i32
    return %c0_i32, %arg1 : i32, i32
  }
  func.func @transform_3(%arg0: i32, %arg1: i32) -> (i32, i32) {
    %c0_i32 = arith.constant 0 : i32
    %c0_i32_0 = arith.constant 0 : i32
    return %arg0, %c0_i32 : i32, i32
  }
}

</mosaic_0001>

<bundles_post_ra>
// kernel: projection_layer.1
= control target key start
LH: loop header
LB: loop body
LE: loop exit
PB: predicated region body
PF: predicated region fallthrough
CT: control target
= control target key end

     0   :  { %v259_v1 = vmov 0.0   ;;  %vm260_vm0 = vmmov 0   ;;  %s319_s0 = inlined_call_operand.vmem [shape: bf16[16,32], index: 0, kind: input, shape index: {}]   ;;  %s320_s1 = inlined_call_operand.vmem [shape: bf16[32,128], index: 1, kind: input, shape index: {}]   ;;  %s321_s2 = inlined_call_operand.vmem [shape: f32[1,128], index: 2, kind: input, shape index: {}]   ;;  %s322_s3 = inlined_call_operand.hbm [shape: f32[16,128], index: 3, kind: output, shape index: {}]  }
   0x1   :  { %v222_v0 = vld [vmem:[%s320_s1 + $0x8] sm:$0xff]   ;;  %205 = vmatprep.subr.bf16.mxu0 %v259_v1  ;;  %v223_v2 = vld [vmem:[%s320_s1] sm:$0xff]   ;;  %209 = vmatprep.mubr.msk.bf16.mxu0 %vm260_vm0, %v259_v1 }
   0x2   :  { %206 = vmatpush3.bf16.msra.mxu0 %v222_v0 }
   0x3   :  { %207 = vmatprep.subr.bf16.mxu0 %v259_v1 }
   0x4   :  { %8 = vsyncpa [#allocation5], 0  ;;  %v224_v3 = vld [vmem:[%s319_s0] sm:$0xff]   ;;  %vm55_vm1 = vcmask 261120   ;;  %vm20_vm2 = vcmask 7168   ;;  %v261_v10 = vmov -inf  }
   0x5   :  { %v197_v4 = vld [vmem:[%s321_s2] ss:$0 sm:$0xff]  ;;  %21 = vst.msk [vmem:[#allocation2] sm:$0xff] %vm20_vm2, %v261_v10  ;;  %22 = vst.msk [vmem:[#allocation2 + $0x8] sm:$0xff] %vm20_vm2, %v261_v10  ;;  %v262_v12 = vmov 0   ;;  %s263_s0 = smov [#allocation4]  }
   0x6   :  { %208 = vmatpush3.bf16.msra.mxu0 %v223_v2  ;;  %23 = vst.msk [vmem:[#allocation3] sm:$0xff] %vm20_vm2, %v259_v1  ;;  %24 = vst.msk [vmem:[#allocation3 + $0x8] sm:$0xff] %vm20_vm2, %v259_v1  ;;  %220 = vset.pattern.permute.xlu1 %v262_v12  ;;  %s185_s1 = sshll.u32 %s263_s0, 4  ;;  %s186_s1 = int_to_ptr.vmem [resolvable:$true] %s185_s1 }
   0x7   :  { %221 = vset.pattern.permute.xlu0 %v262_v12  ;;  %s237_s2 = scalar_lea.vmem %s186_s1, 256  ;;  %p242_p1 = scmp.lt.s32.totalorder %s186_s1, %s186_s1 }
   0x8   :  { %p238_p0 = scmp.ne.s32.totalorder %s186_s1, %s237_s2  ;;  %p243_p2 = scmp.lt.s32.totalorder %s237_s2, %s237_s2 }
   0x9   :  { %210 = vmatmul.mubr.msk.bf16.vlgmr.msra.gmra.mxu0 %vm55_vm1, %v224_v3 }
   0xa   :  { %p244_p3 = por %p243_p2, %p242_p1 }
   0xc   :  { %v106_v13 = vld [vmem:[#allocation2] sm:$0xff]  ;;  %v107_v16 = vld [vmem:[#allocation2 + $0x8] sm:$0xff]  ;;  %p245_p4 = pnand %p244_p3, %p238_p0 }
   0xd   :  { %v114_v32 = vld [vmem:[#allocation3] sm:$0xff]  ;;  %v115_v36 = vld [vmem:[#allocation3 + $0x8] sm:$0xff] }
  0xc9   :  { %v93_v5 = vpop.f32.mrf.mxu0 }
  0xca   :  { %v298_v6 = vadd.f32 %v197_v4, %v93_v5 }
  0xcb   :  { %v211_v7 = vpop.f32.mrf.mxu0 }
  0xcc   :  { %108 = vmax.xlane.f32.xlu0 %v298_v6 }
  0xcd   :  { %v96_v8 = vpop.f32.mrf.mxu0 }
  0xce   :  { %v301_v9 = vadd.f32 %v197_v4, %v96_v8 }
  0xcf   :  { %v212_v11 = vpop.f32.mrf.mxu0 }
  0xd0   :  { %110 = vmax.xlane.f32.xlu0 %v301_v9 }
 0x155   :  { %v109_v14 = vpop.xlane.xlu0 %108 }
 0x156   :  { %v112_v15 = vmax.f32 %v106_v13, %v109_v14 }
 0x158   :  { %v116_v17 = vsub.f32 %v106_v13, %v112_v15  ;;  %149 = vst.msk [vmem:[#allocation2] sm:$0xff] %vm20_vm2, %v112_v15  ;;  %126 = vperm.xlu1 %220, %v112_v15  }
 0x159   :  { %v111_v18 = vpop.xlane.xlu0 %110 }
 0x15a   :  { %v113_v19 = vmax.f32 %v107_v16, %v111_v18  ;;  %v118_v29 = vmul.f32 1.442695, %v116_v17 }
 0x15c   :  { %v117_v20 = vsub.f32 %v107_v16, %v113_v19  ;;  %150 = vst.msk [vmem:[#allocation2 + $0x8] sm:$0xff] %vm20_vm2, %v113_v19  ;;  %131 = vperm.xlu1 %220, %v113_v19  }
 0x15e   :  { %v120_v30 = vmul.f32 1.442695, %v117_v20 }
 0x15f   :  { %v154_v45 = vld [vmem:[#allocation2] sm:$0xff] }
 0x163   :  { %v155_v49 = vld [vmem:[#allocation2 + $0x8] sm:$0xff] }
 0x1d3   :  { %v127_v21 = vpop.permute.xlu1 %126 }
 0x1d4   :  { %v134_v22 = vsub.f32 %v298_v6, %v127_v21 }
 0x1d6   :  { %v136_v23 = vmul.f32 1.442695, %v134_v22 }
 0x1d7   :  { %v132_v24 = vpop.permute.xlu1 %131 }
 0x1d8   :  { %225 = vpow2.f32 %v136_v23  ;;  %v135_v25 = vsub.f32 %v301_v9, %v132_v24 }
 0x1da   :  { %v138_v26 = vmul.f32 1.442695, %v135_v25 }
 0x1dc   :  { %227 = vpow2.f32 %v138_v26 }
 0x1dd   :  { %229 = vpow2.f32 %v118_v29 }
 0x1de   :  { %231 = vpow2.f32 %v120_v30 }
 0x1e5   :  { %v226_v27 = vpop.eup %225 }
 0x1e6   :  { %140 = vadd.xlane.f32.xlu0 %v226_v27 }
 0x1e9   :  { %v228_v28 = vpop.eup %227 }
 0x1ea   :  { %142 = vadd.xlane.f32.xlu1 %v228_v28  ;;  %v230_v31 = vpop.eup %229 }
 0x1eb   :  { %v122_v33 = vmul.f32 %v230_v31, %v114_v32  ;;  %v232_v34 = vpop.eup %231 }
 0x1ec   :  { %v123_v38 = vmul.f32 %v232_v34, %v115_v36 }
 0x26f   :  { %v141_v35 = vpop.xlane.xlu0 %140 }
 0x270   :  { %v144_v37 = vadd.f32 %v141_v35, %v122_v33 }
 0x272   :  { %147 = vst.msk [vmem:[#allocation3] sm:$0xff] %vm20_vm2, %v144_v37 }
 0x273   :  { %v143_v39 = vpop.xlane.xlu1 %142 }
 0x274   :  { %v145_v40 = vadd.f32 %v143_v39, %v123_v38 }
 0x276   :  { %148 = vst.msk [vmem:[#allocation3 + $0x8] sm:$0xff] %vm20_vm2, %v145_v40 }
 0x279   :  { %v156_v41 = vld [vmem:[#allocation3] sm:$0xff] }
 0x27a   :  { %233 = vlog2.f32 %v156_v41 }
 0x27d   :  { %v157_v42 = vld [vmem:[#allocation3 + $0x8] sm:$0xff] }
 0x27e   :  { %235 = vlog2.f32 %v157_v42 }
 0x287   :  { %v234_v43 = vpop.eup %233 }
 0x288   :  { %v159_v44 = vmul.f32 0.6931472, %v234_v43 }
 0x28a   :  { %v162_v46 = vadd.f32 %v159_v44, %v154_v45 }
 0x28b   :  { %v236_v47 = vpop.eup %235 }
 0x28c   :  { %168 = vperm.xlu0 %221, %v162_v46   ;;  %v161_v48 = vmul.f32 0.6931472, %v236_v47 }
 0x28e   :  { %v163_v50 = vadd.f32 %v161_v48, %v155_v49 }
 0x290   :  { %173 = vperm.xlu1 %220, %v163_v50  }
 0x307   :  { %v169_v51 = vpop.permute.xlu0 %168 }
 0x308   :  { %v176_v52 = vsub.f32 %v298_v6, %v169_v51 }
 0x30a   :  { %178 = vst [vmem:[#allocation4] sm:$0xff] %v176_v52 }
 0x30b   :  { %v174_v53 = vpop.permute.xlu1 %173 }
 0x30c   :  { %v177_v54 = vsub.f32 %v301_v9, %v174_v53 }
 0x30e   :  { %179 = vst [vmem:[#allocation4 + $0x8] sm:$0xff] %v177_v54 }
 0x30f   :  { %248 = shalt.err (!%p245_p4)
}
 0x310   :  { %s264_s20 = smov 128   ;;  %s265_s21 = smov 8  }
 0x311   :  { %191 = dma.vmem_to_hbm [thread:$0]  %s186_s1, 256, %s322_s3, [#allocation5], %s264_s20, %s264_s20, %s265_s21  }
 0x312   :  { %257 = dma.done.wait [#allocation5], 256  }
 0x313   :  { %258 = vsyncadd [#allocation5], 4294967040 }
 0x314   :  { %195 = vsyncpa [#allocation5], 1 }

</bundles_post_ra>
